<compile_context>
chip_gen: v6e
topology: v6e:2x2x1
jax: 0.10.0
libtpu: 0.0.40
codegen_flags: <defaults>
</compile_context>

<pallas_src>
import functools
import math

import jax
import jax.numpy as jnp
from jax.experimental import pallas as pl
from jax.experimental.pallas import tpu as pltpu


def _bce(p, y, hard_labels):
    """Elementwise binary cross entropy with PyTorch's log clamp at -100."""
    p = p.astype(jnp.float32)
    y = y.astype(jnp.float32)
    if hard_labels:
        # One transcendental per element (EUP relief on v7x); exact for y in {0,1}.
        return -jnp.maximum(jnp.log(jnp.where(y != 0, p, 1.0 - p)), -100.0)
    logp = jnp.maximum(jnp.log(p), -100.0)
    log1mp = jnp.maximum(jnp.log(1.0 - p), -100.0)
    # -(y*logp + (1-y)*log1mp) == -(log1mp + y*(logp - log1mp))
    return -(log1mp + y * (logp - log1mp))


def _cb_loss_kernel(tr, lanes, n_valid, mask_possible, hard_labels,
                    cp_ref, ct_ref, tp_ref, tt_ref, csum_ref, tsum_ref):
    c = pl.program_id(0)                      # TensorCore split axis ("parallel")
    i = pl.program_id(1)                      # streaming tile axis ("arbitrary")
    g = c * pl.num_programs(1) + i            # logical (unclamped) concept-tile id

    @pl.when(i == 0)
    def _init():
        csum_ref[...] = jnp.zeros_like(csum_ref)
        tsum_ref[...] = jnp.zeros_like(tsum_ref)

    def concept_accum(masked):
        x = _bce(cp_ref[...], ct_ref[...], hard_labels)          # (tr, lanes) f32
        if masked:
            row = jax.lax.broadcasted_iota(jnp.int32, x.shape, 0)
            lane = jax.lax.broadcasted_iota(jnp.int32, x.shape, 1)
            flat = (g * tr + row) * lanes + lane
            # Select drops any garbage (NaN/Inf) from OOB / clamped rows.
            x = jnp.where(flat < n_valid, x, 0.0)
        csum_ref[...] += jnp.sum(x, axis=0)[None, None, :]

    if mask_possible:
        tile_end = (g + 1) * (tr * lanes)
        @pl.when(tile_end <= n_valid)         # hot path: no mask work at all
        def _full():
            concept_accum(False)

        @pl.when(tile_end > n_valid)          # ragged / overhang tiles only
        def _edge():
            concept_accum(True)
    else:
        concept_accum(False)

    # Target BCE streamed alongside the concepts.  Its blocks are padded with
    # (p=1, y=1), which contributes exactly 0, so no masking is ever needed.
    t = _bce(tp_ref[...], tt_ref[...], hard_labels)              # (tr_t, 128)
    tsum_ref[...] += jnp.sum(t, axis=0)[None, None, :]


def _chip_tiling():
    """(per-input block budget bytes, scoped VMEM limit bytes) by generation."""
    vmem_phys = 128 * 1024 * 1024
    try:
        vmem_phys = int(getattr(pltpu.get_tpu_info(), "vmem_capacity_bytes", vmem_phys))
    except Exception:
        pass
    if vmem_phys <= 64 * 1024 * 1024:
        # v7x-class: ~2.5x faster HBM -> bigger blocks to keep the ~0.35us
        # per-grid-step overhead small, budgeted against 64 MiB physical VMEM.
        return 4 * 1024 * 1024, 48 * 1024 * 1024
    # v5e / v6e: 2 MiB blocks already sit near the HBM roofline; 32 MiB limit
    # also lifts v5e's 16 MiB default scoped limit so nothing gets retiled.
    return 2 * 1024 * 1024, 32 * 1024 * 1024


def cb_loss(concepts_pred, concepts_true, target_pred_probs, target_pred_logits,
            target_true, *, alpha=1.0, hard_labels=False, block_rows=None):
    """Returns (target_loss, concepts_loss (C,), summed_concepts_loss, total_loss)."""
    # Binary-target path only (num_classes == 2, no 'weight_loss'), which is the
    # module's default branch: the logits are unused there.
    del target_pred_logits
    B, C = concepts_pred.shape
    n_valid = B * C

    # ---- concept stream layout --------------------------------------------
    if C < 128:
        # Lane-dense: flatten row-major and view as (rows, L), L = lcm(C, 128),
        # so concept id == lane % C and every vreg lane carries real data.
        lanes = C * (128 // math.gcd(C, 128))
        total_rows = -(-n_valid // lanes)
        padded = total_rows * lanes
        cp2 = concepts_pred.reshape(-1)
        ct2 = concepts_true.reshape(-1)
        if padded != n_valid:
            # Pad with p=1, y=1 => BCE == 0, so padding never contributes.
            cp2 = jnp.pad(cp2, (0, padded - n_valid), constant_values=1.0)
            ct2 = jnp.pad(ct2, (0, padded - n_valid), constant_values=1.0)
        cp2 = cp2.reshape(total_rows, lanes)
        ct2 = ct2.reshape(total_rows, lanes)
    else:
        # Wide C: the natural (B, C) layout is already lane-dense enough.
        lanes = C
        total_rows = B
        cp2, ct2 = concepts_pred, concepts_true

    # ---- row tile: account for 128-lane VMEM padding + dtype sublane packing --
    itemsize = min(jnp.dtype(cp2.dtype).itemsize, jnp.dtype(ct2.dtype).itemsize)
    pack = max(8, 32 // itemsize)                    # f32:8, bf16:16, int8/fp8:32
    lanes_padded = -(-lanes // 128) * 128            # true VMEM width of a block row
    budget, vmem_limit = _chip_tiling()
    tr = max(pack, (budget // (lanes_padded * itemsize) // pack) * pack)
    if block_rows is not None:                       # test / tuning override
        tr = max(pack, (int(block_rows) // pack) * pack)
    if tr >= total_rows:
        tr = total_rows                              # single full-extent block
    nb = -(-total_rows // tr)                        # real concept tiles

    # ---- TensorCore split (2 TCs on v7x; harmless / serial elsewhere) -------
    n_split = 2 if nb >= 2 else 1
    half = -(-nb // n_split)                         # tiles per core
    n_tiles = n_split * half                         # logical tiles incl. overhang
    mask_possible = (n_tiles * tr != total_rows)     # any ragged / overhang tile?

    # ---- target stream: (rows_t, 128), padded with (p=1, y=1) => 0 ----------
    pack_t = max(8, 32 // min(jnp.dtype(target_pred_probs.dtype).itemsize,
                              jnp.dtype(target_true.dtype).itemsize))
    rows_t = -(-B // 128)
    tr_t = -(-rows_t // n_tiles)
    tr_t = -(-tr_t // pack_t) * pack_t
    padded_t = n_tiles * tr_t * 128
    tp2 = jnp.pad(target_pred_probs.reshape(-1), (0, padded_t - B),
                  constant_values=1.0).reshape(n_tiles * tr_t, 128)
    tt2 = jnp.pad(target_true.reshape(-1), (0, padded_t - B),
                  constant_values=1.0).reshape(n_tiles * tr_t, 128)

    # ---- BlockSpecs ----------------------------------------------------------
    def concept_map(c, i):
        g = c * half + i
        # Clamp overhang tiles to the last real block (fully masked in-kernel).
        return (jnp.minimum(g, nb - 1), 0)

    def target_map(c, i):
        return (c * half + i, 0)

    kernel = functools.partial(_cb_loss_kernel, int(tr), int(lanes), int(n_valid),
                               bool(mask_possible), bool(hard_labels))

    cost = pl.CostEstimate(
        flops=(4 if hard_labels else 8) * (n_valid + B),
        transcendentals=(1 if hard_labels else 2) * (n_valid + B),
        bytes_accessed=(cp2.size * cp2.dtype.itemsize + ct2.size * ct2.dtype.itemsize
                        + tp2.size * tp2.dtype.itemsize + tt2.size * tt2.dtype.itemsize
                        + n_split * (lanes + 128) * 4),
    )

    grid_spec = pltpu.PrefetchScalarGridSpec(
        num_scalar_prefetch=0,
        grid=(n_split, half),
        in_specs=[
            pl.BlockSpec((tr, lanes), concept_map),      # concept probs tile
            pl.BlockSpec((tr, lanes), concept_map),      # concept labels tile
            # TODO(synk): on v5e add pipeline_mode=pl.Buffered(3) to the two
            #             concept specs if xprof shows exposed DMA at tile edges.
            pl.BlockSpec((tr_t, 128), target_map),       # target probs tile
            pl.BlockSpec((tr_t, 128), target_map),       # target labels tile
        ],
        out_specs=(
            pl.BlockSpec((1, 1, lanes), lambda c, i: (c, 0, 0)),  # per-core lane sums
            pl.BlockSpec((1, 1, 128), lambda c, i: (c, 0, 0)),    # per-core target sums
        ),
    )

    csum, tsum = pl.pallas_call(
        kernel,
        out_shape=(jax.ShapeDtypeStruct((n_split, 1, lanes), jnp.float32),
                   jax.ShapeDtypeStruct((n_split, 1, 128), jnp.float32)),
        grid_spec=grid_spec,
        compiler_params=pltpu.CompilerParams(
            dimension_semantics=("parallel", "arbitrary"),
            vmem_limit_bytes=vmem_limit),
        cost_estimate=cost,
    )(cp2, ct2, tp2, tt2)

    # ---- tiny final combine (per-core partials + lane fold + scalars) -------
    inv_b = 1.0 / B
    col_sums = jnp.sum(csum, axis=(0, 1))                         # (lanes,)
    concepts_loss = col_sums.reshape(-1, C).sum(axis=0) * inv_b   # (C,) mean over batch
    summed_concepts_loss = jnp.sum(concepts_loss)
    target_loss = jnp.sum(tsum) * inv_b
    total_loss = target_loss + alpha * summed_concepts_loss
    return target_loss, concepts_loss, summed_concepts_loss, total_loss


# ----------------------------- reference & test ------------------------------

def _reference(cp, ct, tp, tt, alpha=1.0):
    cp = cp.astype(jnp.float32); ct = ct.astype(jnp.float32)
    tp = tp.astype(jnp.float32); tt = tt.astype(jnp.float32)
    logp = jnp.maximum(jnp.log(cp), -100.0)
    log1mp = jnp.maximum(jnp.log(1.0 - cp), -100.0)
    concepts_loss = jnp.mean(-(ct * logp + (1.0 - ct) * log1mp), axis=0)
    summed = jnp.sum(concepts_loss)
    tlogp = jnp.maximum(jnp.log(tp), -100.0)
    tlog1mp = jnp.maximum(jnp.log(1.0 - tp), -100.0)
    target_loss = jnp.mean(-(tt * tlogp + (1.0 - tt) * tlog1mp))
    return target_loss, concepts_loss, summed, target_loss + alpha * summed


def _check(name, got, want, atol=1e-4, rtol=1e-4):
    names = ("target_loss", "concepts_loss", "summed_concepts_loss", "total_loss")
    for n, g, w in zip(names, got, want):
        assert jnp.allclose(g, w, atol=atol, rtol=rtol), (name, n, g, w)


def _make_inputs(key, batch, n_concepts, num_classes=2):
    k1, k2, k3, k4, k5 = jax.random.split(key, 5)
    concepts_pred = jax.nn.sigmoid(jax.random.normal(k1, (batch, n_concepts), jnp.float32))
    concepts_true = (jax.random.uniform(k2, (batch, n_concepts)) > 0.5).astype(jnp.float32)
    target_pred_logits = jax.random.normal(k3, (batch, num_classes), jnp.float32)
    target_pred_probs = jax.nn.sigmoid(jax.random.normal(k4, (batch,), jnp.float32))
    target_true = (jax.random.uniform(k5, (batch,)) > 0.5).astype(jnp.float32)
    return concepts_pred, concepts_true, target_pred_probs, target_pred_logits, target_true


if __name__ == "__main__":
    key = jax.random.PRNGKey(0)
    k1, k2, k3 = jax.random.split(key, 3)

    # 1) Module-sized shapes: lane-dense path, single tile, exact two-log BCE.
    args = _make_inputs(k1, batch=8, n_concepts=4)
    got = jax.block_until_ready(cb_loss(*args, alpha=1.0))
    _check("small", got, _reference(args[0], args[1], args[2], args[4], alpha=1.0))

    # 2) Multi-tile streaming + two-TensorCore split + ragged/overhang masking
    #    + streamed target path + hard-label single-log fast path.
    args = _make_inputs(k2, batch=300, n_concepts=8)
    got = jax.block_until_ready(
        cb_loss(*args, alpha=0.5, hard_labels=True, block_rows=8))
    _check("tiled", got, _reference(args[0], args[1], args[2], args[4], alpha=0.5))

    # 3) Wide-concept fallback layout (C >= 128 keeps the natural (B, C) tiling).
    args = _make_inputs(k3, batch=20, n_concepts=130)
    got = jax.block_until_ready(cb_loss(*args, alpha=1.0))
    _check("wide", got, _reference(args[0], args[1], args[2], args[4], alpha=1.0))

    print("KERNEL_OK")
</pallas_src>

<mosaic_0001>
module attributes {stable_mosaic.version = 11 : i64} {
  func.func @_cb_loss_kernel(%arg0: i32, %arg1: i32, %arg2: memref<1x128xf32, #tpu.memory_space<vmem>>, %arg3: memref<1x128xf32, #tpu.memory_space<vmem>>, %arg4: memref<8x128xf32, #tpu.memory_space<vmem>>, %arg5: memref<8x128xf32, #tpu.memory_space<vmem>>, %arg6: memref<1x1x128xf32, #tpu.memory_space<vmem>>, %arg7: memref<1x1x128xf32, #tpu.memory_space<vmem>>) attributes {dimension_semantics = [#tpu.dimension_semantics<parallel>, #tpu.dimension_semantics<arbitrary>], iteration_bounds = array<i64: 1, 1>, scalar_prefetch = 0 : i64, scratch_operands = 0 : i64, tpu.core_type = #tpu.core_type<tc>, window_params = [{transform_indices = @transform_0, window_bounds = array<i64: 1, 128>}, {transform_indices = @transform_1, window_bounds = array<i64: 1, 128>}, {transform_indices = @transform_2, window_bounds = array<i64: 8, 128>}, {transform_indices = @transform_3, window_bounds = array<i64: 8, 128>}, {transform_indices = @transform_4, window_bounds = array<i64: 1, 1, 128>}, {transform_indices = @transform_5, window_bounds = array<i64: 1, 1, 128>}]} {
    %c0_i32 = arith.constant 0 : i32
    %0 = arith.cmpi eq, %arg1, %c0_i32 : i32
    %1 = arith.extui %0 : i1 to i32
    %c0_i32_0 = arith.constant 0 : i32
    %2 = arith.cmpi ne, %1, %c0_i32_0 : i32
    scf.if %2 {
      %cst_29 = arith.constant 0.000000e+00 : f32
      %43 = vector.broadcast %cst_29 : f32 to vector<1x1x128xf32>
      %c0_30 = arith.constant 0 : index
      %c0_31 = arith.constant 0 : index
      %c0_32 = arith.constant 0 : index
      %44 = vector.load %arg6[%c0_30, %c0_31, %c0_32] : memref<1x1x128xf32, #tpu.memory_space<vmem>>, vector<1x1x128xf32>
      tpu.vector_store %arg6[%c0_30, %c0_31, %c0_32], %43 {strides = array<i32>} : memref<1x1x128xf32, #tpu.memory_space<vmem>>, vector<1x1x128xf32>,
      %cst_33 = arith.constant 0.000000e+00 : f32
      %45 = vector.broadcast %cst_33 : f32 to vector<1x1x128xf32>
      %c0_34 = arith.constant 0 : index
      %c0_35 = arith.constant 0 : index
      %c0_36 = arith.constant 0 : index
      %46 = vector.load %arg7[%c0_34, %c0_35, %c0_36] : memref<1x1x128xf32, #tpu.memory_space<vmem>>, vector<1x1x128xf32>
      tpu.vector_store %arg7[%c0_34, %c0_35, %c0_36], %45 {strides = array<i32>} : memref<1x1x128xf32, #tpu.memory_space<vmem>>, vector<1x1x128xf32>,
    } else {
    }
    %c0 = arith.constant 0 : index
    %c0_1 = arith.constant 0 : index
    %3 = vector.load %arg2[%c0, %c0_1] : memref<1x128xf32, #tpu.memory_space<vmem>>, vector<1x128xf32>
    %c0_2 = arith.constant 0 : index
    %c0_3 = arith.constant 0 : index
    %4 = vector.load %arg3[%c0_2, %c0_3] : memref<1x128xf32, #tpu.memory_space<vmem>>, vector<1x128xf32>
    %5 = math.log %3 : vector<1x128xf32>
    %cst = arith.constant -1.000000e+02 : f32
    %6 = vector.broadcast %cst : f32 to vector<1x128xf32>
    %7 = arith.maximumf %5, %6 : vector<1x128xf32>
    %cst_4 = arith.constant 1.000000e+00 : f32
    %8 = vector.broadcast %cst_4 : f32 to vector<1x128xf32>
    %9 = arith.subf %8, %3 : vector<1x128xf32>
    %10 = math.log %9 : vector<1x128xf32>
    %cst_5 = arith.constant -1.000000e+02 : f32
    %11 = vector.broadcast %cst_5 : f32 to vector<1x128xf32>
    %12 = arith.maximumf %10, %11 : vector<1x128xf32>
    %13 = arith.subf %7, %12 : vector<1x128xf32>
    %14 = arith.mulf %4, %13 : vector<1x128xf32>
    %15 = arith.addf %12, %14 : vector<1x128xf32>
    %cst_6 = arith.constant 0.000000e+00 : f32
    %16 = vector.broadcast %cst_6 : f32 to vector<1x128xf32>
    %17 = arith.subf %16, %15 : vector<1x128xf32>
    %c0_7 = arith.constant 0 : index
    %c0_8 = arith.constant 0 : index
    %c0_9 = arith.constant 0 : index
    %18 = vector.load %arg6[%c0_7, %c0_8, %c0_9] : memref<1x1x128xf32, #tpu.memory_space<vmem>>, vector<1x1x128xf32>
    %cst_10 = arith.constant dense<0.000000e+00> : vector<128xf32>
    %19 = vector.multi_reduction <add>, %17, %cst_10 [0] : vector<1x128xf32> to vector<128xf32>
    %20 = vector.shape_cast %19 : vector<128xf32> to vector<1x1x128xf32>
    %21 = arith.addf %18, %20 : vector<1x1x128xf32>
    %c0_11 = arith.constant 0 : index
    %c0_12 = arith.constant 0 : index
    %c0_13 = arith.constant 0 : index
    %22 = vector.load %arg6[%c0_11, %c0_12, %c0_13] : memref<1x1x128xf32, #tpu.memory_space<vmem>>, vector<1x1x128xf32>
    tpu.vector_store %arg6[%c0_11, %c0_12, %c0_13], %21 {strides = array<i32>} : memref<1x1x128xf32, #tpu.memory_space<vmem>>, vector<1x1x128xf32>,
    %c0_14 = arith.constant 0 : index
    %c0_15 = arith.constant 0 : index
    %23 = vector.load %arg4[%c0_14, %c0_15] : memref<8x128xf32, #tpu.memory_space<vmem>>, vector<8x128xf32>
    %c0_16 = arith.constant 0 : index
    %c0_17 = arith.constant 0 : index
    %24 = vector.load %arg5[%c0_16, %c0_17] : memref<8x128xf32, #tpu.memory_space<vmem>>, vector<8x128xf32>
    %25 = math.log %23 : vector<8x128xf32>
    %cst_18 = arith.constant -1.000000e+02 : f32
    %26 = vector.broadcast %cst_18 : f32 to vector<8x128xf32>
    %27 = arith.maximumf %25, %26 : vector<8x128xf32>
    %cst_19 = arith.constant 1.000000e+00 : f32
    %28 = vector.broadcast %cst_19 : f32 to vector<8x128xf32>
    %29 = arith.subf %28, %23 : vector<8x128xf32>
    %30 = math.log %29 : vector<8x128xf32>
    %cst_20 = arith.constant -1.000000e+02 : f32
    %31 = vector.broadcast %cst_20 : f32 to vector<8x128xf32>
    %32 = arith.maximumf %30, %31 : vector<8x128xf32>
    %33 = arith.subf %27, %32 : vector<8x128xf32>
    %34 = arith.mulf %24, %33 : vector<8x128xf32>
    %35 = arith.addf %32, %34 : vector<8x128xf32>
    %cst_21 = arith.constant 0.000000e+00 : f32
    %36 = vector.broadcast %cst_21 : f32 to vector<8x128xf32>
    %37 = arith.subf %36, %35 : vector<8x128xf32>
    %c0_22 = arith.constant 0 : index
    %c0_23 = arith.constant 0 : index
    %c0_24 = arith.constant 0 : index
    %38 = vector.load %arg7[%c0_22, %c0_23, %c0_24] : memref<1x1x128xf32, #tpu.memory_space<vmem>>, vector<1x1x128xf32>
    %cst_25 = arith.constant dense<0.000000e+00> : vector<128xf32>
    %39 = vector.multi_reduction <add>, %37, %cst_25 [0] : vector<8x128xf32> to vector<128xf32>
    %40 = vector.shape_cast %39 : vector<128xf32> to vector<1x1x128xf32>
    %41 = arith.addf %38, %40 : vector<1x1x128xf32>
    %c0_26 = arith.constant 0 : index
    %c0_27 = arith.constant 0 : index
    %c0_28 = arith.constant 0 : index
    %42 = vector.load %arg7[%c0_26, %c0_27, %c0_28] : memref<1x1x128xf32, #tpu.memory_space<vmem>>, vector<1x1x128xf32>
    tpu.vector_store %arg7[%c0_26, %c0_27, %c0_28], %41 {strides = array<i32>} : memref<1x1x128xf32, #tpu.memory_space<vmem>>, vector<1x1x128xf32>,
    return
  }
  func.func @transform_0(%arg0: i32, %arg1: i32) -> (i32, i32) {
    %c1_i32 = arith.constant 1 : i32
    %0 = arith.muli %arg0, %c1_i32 : i32
    %1 = arith.addi %0, %arg1 : i32
    %c0_i32 = arith.constant 0 : i32
    %2 = arith.minsi %1, %c0_i32 : i32
    %c0_i32_0 = arith.constant 0 : i32
    %c0_i32_1 = arith.constant 0 : i32
    return %2, %c0_i32_0 : i32, i32
  }
  func.func @transform_1(%arg0: i32, %arg1: i32) -> (i32, i32) {
    %c1_i32 = arith.constant 1 : i32
    %0 = arith.muli %arg0, %c1_i32 : i32
    %1 = arith.addi %0, %arg1 : i32
    %c0_i32 = arith.constant 0 : i32
    %2 = arith.minsi %1, %c0_i32 : i32
    %c0_i32_0 = arith.constant 0 : i32
    %c0_i32_1 = arith.constant 0 : i32
    return %2, %c0_i32_0 : i32, i32
  }
  func.func @transform_2(%arg0: i32, %arg1: i32) -> (i32, i32) {
    %c1_i32 = arith.constant 1 : i32
    %0 = arith.muli %arg0, %c1_i32 : i32
    %1 = arith.addi %0, %arg1 : i32
    %c0_i32 = arith.constant 0 : i32
    %c0_i32_0 = arith.constant 0 : i32
    return %1, %c0_i32 : i32, i32
  }
  func.func @transform_3(%arg0: i32, %arg1: i32) -> (i32, i32) {
    %c1_i32 = arith.constant 1 : i32
    %0 = arith.muli %arg0, %c1_i32 : i32
    %1 = arith.addi %0, %arg1 : i32
    %c0_i32 = arith.constant 0 : i32
    %c0_i32_0 = arith.constant 0 : i32
    return %1, %c0_i32 : i32, i32
  }
  func.func @transform_4(%arg0: i32, %arg1: i32) -> (i32, i32, i32) {
    %c0_i32 = arith.constant 0 : i32
    %c0_i32_0 = arith.constant 0 : i32
    %c0_i32_1 = arith.constant 0 : i32
    return %arg0, %c0_i32, %c0_i32_0 : i32, i32, i32
  }
  func.func @transform_5(%arg0: i32, %arg1: i32) -> (i32, i32, i32) {
    %c0_i32 = arith.constant 0 : i32
    %c0_i32_0 = arith.constant 0 : i32
    %c0_i32_1 = arith.constant 0 : i32
    return %arg0, %c0_i32, %c0_i32_0 : i32, i32, i32
  }
}

</mosaic_0001>

<bundles_post_ra>
// kernel: tpu_custom_call.1
= control target key start
LH: loop header
LB: loop body
LE: loop exit
PB: predicated region body
PF: predicated region fallthrough
CT: control target
= control target key end

     0   :  { %11 = vsyncpa [#allocation3], 0  ;;  %s352_s0 = inlined_call_operand.hbm [shape: f32[1,128], index: 0, kind: input, shape index: {}]   ;;  %s353_s1 = inlined_call_operand.vmem [shape: f32[1,128], index: 1, kind: input, shape index: {}]   ;;  %s354_s2 = inlined_call_operand.hbm [shape: f32[8,128], index: 2, kind: input, shape index: {}]   ;;  %s355_s3 = inlined_call_operand.hbm [shape: f32[8,128], index: 3, kind: input, shape index: {}]   ;;  %s356_s4 = inlined_call_operand.hbm [shape: f32[1,1,128], index: 4, kind: output, shape index: {0}]   ;;  %s357_s5 = inlined_call_operand.hbm [shape: f32[1,1,128], index: 5, kind: output, shape index: {1}]  }
   0x1   :  { %12 = vsyncpa [#allocation6], 0 }
   0x2   :  { %13 = vsyncpa [#allocation4], 0 }
   0x3   :  { %14 = vsyncpa [#allocation10], 0  ;;  %s298_s18 = smov [#allocation5]   ;;  %s299_s20 = smov [#allocation2]  }
   0x4   :  { %s50_s19 = sshll.u32 %s298_s18, 4  ;;  %s26_s21 = sshll.u32 %s299_s20, 4  ;;  %s51_s19 = int_to_ptr.vmem [resolvable:$true] %s50_s19  ;;  %s27_s21 = int_to_ptr.vmem [resolvable:$true] %s26_s21 }
   0x5   :  { %s198_s22 = scalar_lea.vmem %s51_s19, 128  ;;  %p203_p1 = scmp.lt.s32.totalorder %s51_s19, %s51_s19 }
   0x6   :  { %p199_p0 = scmp.ne.s32.totalorder %s51_s19, %s198_s22  ;;  %p204_p2 = scmp.lt.s32.totalorder %s198_s22, %s198_s22 }
   0x8   :  { %p205_p3 = por %p204_p2, %p203_p1 }
   0xa   :  { %p206_p4 = pnand %p205_p3, %p199_p0 }
   0xc   :  { %209 = shalt.err (!%p206_p4)
}
   0xd   :  { %53 = dma.hbm_to_vmem [thread:$0]  %s354_s2, 128, %s51_s19, [#allocation6]  }
   0xe   :  { %s218_s25 = scalar_lea.vmem %s27_s21, 16  ;;  %s222_s26 = scalar_lea.vmem %s27_s21, 32 }
   0xf   :  { %p219_p5 = scmp.ne.s32.totalorder %s27_s21, %s218_s25  ;;  %p223_p6 = scmp.lt.s32.totalorder %s27_s21, %s27_s21 }
  0x10   :  { %p224_p7 = scmp.lt.s32.totalorder %s222_s26, %s218_s25 }
  0x12   :  { %p225_p8 = por %p224_p7, %p223_p6 }
  0x14   :  { %p226_p9 = pnand %p225_p8, %p219_p5 }
  0x16   :  { %229 = shalt.err (!%p226_p9)
}
  0x17   :  { %29 = dma.hbm_to_vmem [thread:$0]  %s352_s0, 16, %s27_s21, [#allocation3]  }
  0x18   :  { %s300_s29 = smov [#allocation7]  }
  0x19   :  { %s63_s30 = sshll.u32 %s300_s29, 4  ;;  %s64_s30 = int_to_ptr.vmem [resolvable:$true] %s63_s30 }
  0x1a   :  { %s238_s6 = scalar_lea.vmem %s64_s30, 128  ;;  %p243_p11 = scmp.lt.s32.totalorder %s64_s30, %s64_s30 }
  0x1b   :  { %p239_p10 = scmp.ne.s32.totalorder %s64_s30, %s238_s6  ;;  %p244_p12 = scmp.lt.s32.totalorder %s238_s6, %s238_s6 }
  0x1d   :  { %p245_p13 = por %p244_p12, %p243_p11 }
  0x1f   :  { %p246_p0 = pnand %p245_p13, %p239_p10 }
  0x21   :  { %249 = shalt.err (!%p246_p0)
}
  0x22   :  { %66 = dma.hbm_to_vmem [thread:$0]  %s355_s3, 128, %s64_s30, [#allocation6]  }
  0x23   :  { %290 = dma.done.wait [#allocation3], 16  }
  0x24   :  { %291 = vsyncadd [#allocation3], 4294967280 }
  0x25   :  { %292 = dma.done.wait [#allocation6], 256  }
  0x26   :  { %293 = vsyncadd [#allocation6], 4294967040  ;;  %v301_v0 = vmov 0.0   ;;  %v102_v1 = vld [vmem:[#allocation2] sm:$0x1]  ;;  %v119_v2 = vld [vmem:[#allocation5] sm:$0xff] }
  0x27   :  { %100 = vst [vmem:[#allocation8] sm:$0x1] %v301_v0  ;;  %101 = vst [vmem:[#allocation9] sm:$0x1] %v301_v0  ;;  %182 = vlog2.f32 %v102_v1  ;;  %v107_v3 = vsub.f32 1.0, %v102_v1  ;;  %v124_v4 = vsub.f32 1.0, %v119_v2 }
  0x28   :  { %184 = vlog2.f32 %v119_v2  ;;  %v103_v16 = vld [vmem:[%s353_s1] sm:$0x1]  ;;  %v120_v19 = vld [vmem:[#allocation7] sm:$0xff]  ;;  %s302_s8 = smov [#allocation8]  }
  0x29   :  { %186 = vlog2.f32 %v107_v3  ;;  %s147_s9 = sshll.u32 %s302_s8, 4  ;;  %s148_s9 = int_to_ptr.vmem [resolvable:$true] %s147_s9 }
  0x2a   :  { %188 = vlog2.f32 %v124_v4  ;;  %s250_s10 = scalar_lea.vmem %s148_s9, 16  ;;  %s254_s1 = scalar_lea.vmem %s148_s9, 32 }
  0x2b   :  { %p251_p1 = scmp.ne.s32.totalorder %s148_s9, %s250_s10  ;;  %p255_p2 = scmp.lt.s32.totalorder %s148_s9, %s148_s9 }
  0x2c   :  { %p256_p3 = scmp.lt.s32.totalorder %s254_s1, %s250_s10 }
  0x2e   :  { %v115_v24 = vld [vmem:[#allocation8] sm:$0x1]  ;;  %p257_p4 = por %p256_p3, %p255_p2 }
  0x30   :  { %p258_p5 = pnand %p257_p4, %p251_p1 }
  0x34   :  { %v183_v5 = vpop.eup %182 }
  0x35   :  { %v185_v6 = vpop.eup %184  ;;  %v105_v7 = vmul.f32 0.6931472, %v183_v5 }
  0x36   :  { %v187_v8 = vpop.eup %186  ;;  %v122_v9 = vmul.f32 0.6931472, %v185_v6 }
  0x37   :  { %v189_v10 = vpop.eup %188  ;;  %v106_v11 = vmax.f32 %v105_v7, -100.0  ;;  %v109_v12 = vmul.f32 0.6931472, %v187_v8 }
  0x38   :  { %v123_v13 = vmax.f32 %v122_v9, -100.0  ;;  %v126_v14 = vmul.f32 0.6931472, %v189_v10 }
  0x39   :  { %v110_v15 = vmax.f32 %v109_v12, -100.0 }
  0x3a   :  { %v127_v17 = vmax.f32 %v126_v14, -100.0 }
  0x3b   :  { %v111_v18 = vsub.f32 %v106_v11, %v110_v15 }
  0x3c   :  { %v128_v20 = vsub.f32 %v123_v13, %v127_v17 }
  0x3d   :  { %v112_v21 = vmul.f32 %v111_v18, %v103_v16 }
  0x3e   :  { %v129_v22 = vmul.f32 %v128_v20, %v120_v19 }
  0x3f   :  { %v113_v23 = vadd.f32 %v112_v21, %v110_v15 }
  0x40   :  { %v130_v25 = vadd.f32 %v129_v22, %v127_v17 }
  0x41   :  { %v114_v26 = vsub.f32 0.0, %v113_v23 }
  0x42   :  { %v131_v27 = vsub.f32 0.0, %v130_v25 }
  0x43   :  { %v117_v28 = vadd.f32 %v115_v24, %v114_v26 }
  0x44   :  { %v133_v29 = vrot.slane %v131_v27, 4 }
  0x45   :  { %118 = vst [vmem:[#allocation8] sm:$0x1] %v117_v28 }
  0x46   :  { %v134_v30 = vadd.f32 %v133_v29, %v131_v27 }
  0x47   :  { %261 = shalt.err (!%p258_p5)
}
  0x48   :  { %150 = dma.vmem_to_hbm [thread:$0]  %s148_s9, 16, %s356_s4, [#allocation4]   ;;  %v135_v31 = vrot.slane %v134_v30, 2  ;;  %v132_v34 = vld [vmem:[#allocation9] sm:$0x1] }
  0x49   :  { %s303_s13 = smov [#allocation9]  }
  0x4a   :  { %v136_v32 = vadd.f32 %v135_v31, %v134_v30  ;;  %s157_s14 = sshll.u32 %s303_s13, 4  ;;  %s158_s14 = int_to_ptr.vmem [resolvable:$true] %s157_s14 }
  0x4b   :  { %s270_s15 = scalar_lea.vmem %s158_s14, 16  ;;  %s274_s16 = scalar_lea.vmem %s158_s14, 32 }
  0x4c   :  { %v137_v33 = vrot.slane %v136_v32, 1  ;;  %p271_p6 = scmp.ne.s32.totalorder %s158_s14, %s270_s15  ;;  %p275_p7 = scmp.lt.s32.totalorder %s158_s14, %s158_s14 }
  0x4d   :  { %p276_p8 = scmp.lt.s32.totalorder %s274_s16, %s270_s15 }
  0x4e   :  { %v138_v35 = vadd.f32 %v137_v33, %v136_v32 }
  0x4f   :  { %p277_p9 = por %p276_p8, %p275_p7 }
  0x50   :  { %v139_v36 = vadd.f32 %v138_v35, %v132_v34 }
  0x51   :  { %p278_p10 = pnand %p277_p9, %p271_p6 }
  0x52   :  { %140 = vst [vmem:[#allocation9] sm:$0x1] %v139_v36 }
  0x53   :  { %281 = shalt.err (!%p278_p10)
}
  0x54   :  { %160 = dma.vmem_to_hbm [thread:$0]  %s158_s14, 16, %s357_s5, [#allocation10]  }
  0x55   :  { %294 = dma.done.wait [#allocation4], 16  }
  0x56   :  { %295 = vsyncadd [#allocation4], 4294967280 }
  0x57   :  { %296 = dma.done.wait [#allocation10], 16  }
  0x58   :  { %297 = vsyncadd [#allocation10], 4294967280 }
  0x59   :  { %167 = vsyncpa [#allocation3], 1 }
  0x5a   :  { %168 = vsyncpa [#allocation6], 1 }
  0x5b   :  { %169 = vsyncpa [#allocation4], 1 }
  0x5c   :  { %170 = vsyncpa [#allocation10], 1 }

</bundles_post_ra>
